<compile_context>
chip_gen: v5e
topology: v5e:2x2
jax: 0.10.0
libtpu: 0.0.40
codegen_flags: <defaults>
</compile_context>

<pallas_src>
import jax
import jax.numpy as jnp
from jax import lax
from jax.experimental import pallas as pl
from jax.experimental.pallas import tpu as pltpu

HIDDEN_DIM = 128
N_ACTIONS = 5
Q_PAD = 128          # lane-dense padded width for the fc2 output
T_CHUNK_CANDIDATES = (16, 8, 4, 2, 1)   # timesteps per grid step (must divide T)


# ---------------------------------------------------------------------------
# Shared math (used identically by the kernels and the pure-JAX references)
# ---------------------------------------------------------------------------
def _gru_step_fused(x, h, w1, b1, w_rz, b_rz, w_ihn, b_ihn, w_hhn, b_hhn, w2, b2):
    """fc1+ReLU, GRUCell with rz-fused gate matmul, fc2.

    bf16 matmul operands, f32 accumulation (preferred_element_type) and f32 gate math.
    Semantically identical to PyTorch GRUCell ([r, z, n] ordering, n = tanh(gi_n + r*gh_n)).
    """
    H = HIDDEN_DIM
    xh = jnp.dot(x.astype(jnp.bfloat16), w1, preferred_element_type=jnp.float32) + b1
    xh = jnp.maximum(xh, 0.0)

    xh_bf = xh.astype(jnp.bfloat16)
    h_bf = h.astype(jnp.bfloat16)

    # Fused r,z pre-activations: one K=2H, N=2H matmul (native 256x256 MXU tile).
    rz = jnp.dot(jnp.concatenate([xh_bf, h_bf], axis=-1), w_rz,
                 preferred_element_type=jnp.float32) + b_rz
    r = jax.nn.sigmoid(rz[:, 0:H])
    z = jax.nn.sigmoid(rz[:, H:2 * H])

    # n gate needs gi_n and gh_n separately -> two (H,H) matmuls.
    gi_n = jnp.dot(xh_bf, w_ihn, preferred_element_type=jnp.float32) + b_ihn
    gh_n = jnp.dot(h_bf, w_hhn, preferred_element_type=jnp.float32) + b_hhn
    n = jnp.tanh(gi_n + r * gh_n)

    h_new = (1.0 - z) * n + z * h
    q = jnp.dot(h_new.astype(jnp.bfloat16), w2, preferred_element_type=jnp.float32) + b2
    return q, h_new


def _mlp_step(x, w1, b1, wr, br, w2, b2):
    """fc1+ReLU, Linear+ReLU (use_rnn=False), fc2."""
    xh = jnp.maximum(
        jnp.dot(x.astype(jnp.bfloat16), w1, preferred_element_type=jnp.float32) + b1, 0.0)
    h_new = jnp.maximum(
        jnp.dot(xh.astype(jnp.bfloat16), wr, preferred_element_type=jnp.float32) + br, 0.0)
    q = jnp.dot(h_new.astype(jnp.bfloat16), w2, preferred_element_type=jnp.float32) + b2
    return q, h_new


# ---------------------------------------------------------------------------
# Kernels
# ---------------------------------------------------------------------------
def _gru_agent_kernel(x_ref, h_ref,
                      w1_ref, b1_ref, wrz_ref, brz_ref,
                      wihn_ref, bihn_ref, whhn_ref, bhhn_ref,
                      w2_ref, b2_ref, q_ref, hout_ref):
    q, h_new = _gru_step_fused(
        x_ref[...], h_ref[...].astype(jnp.float32),
        w1_ref[...], b1_ref[...], wrz_ref[...], brz_ref[...],
        wihn_ref[...], bihn_ref[...], whhn_ref[...], bhhn_ref[...],
        w2_ref[...], b2_ref[...])
    q_ref[...] = q.astype(q_ref.dtype)
    hout_ref[...] = h_new.astype(hout_ref.dtype)


def _mlp_agent_kernel(x_ref,
                      w1_ref, b1_ref, wr_ref, br_ref,
                      w2_ref, b2_ref, q_ref, hout_ref):
    q, h_new = _mlp_step(x_ref[...],
                         w1_ref[...], b1_ref[...],
                         wr_ref[...], br_ref[...],
                         w2_ref[...], b2_ref[...])
    q_ref[...] = q.astype(q_ref.dtype)
    hout_ref[...] = h_new.astype(hout_ref.dtype)


def _gru_rollout_kernel(x_ref, h0_ref,
                        w1_ref, b1_ref, wrz_ref, brz_ref,
                        wihn_ref, bihn_ref, whhn_ref, bhhn_ref,
                        w2_ref, b2_ref, q_ref, hout_ref):
    """Grid = (batch_blocks [parallel], time_chunks [arbitrary]).

    Each grid step runs T_CHUNK timesteps with an unrolled fori_loop. Weights are
    VMEM-resident across the whole grid; h is carried in the resident hout block.
    """
    @pl.when(pl.program_id(1) == 0)
    def _():
        hout_ref[...] = h0_ref[...]

    w1, b1 = w1_ref[...], b1_ref[...]
    w_rz, b_rz = wrz_ref[...], brz_ref[...]
    w_ihn, b_ihn = wihn_ref[...], bihn_ref[...]
    w_hhn, b_hhn = whhn_ref[...], bhhn_ref[...]
    w2, b2 = w2_ref[...], b2_ref[...]

    t_chunk = x_ref.shape[0]

    def body(t, h):
        q, h_new = _gru_step_fused(x_ref[t], h, w1, b1, w_rz, b_rz,
                                   w_ihn, b_ihn, w_hhn, b_hhn, w2, b2)
        q_ref[t] = q.astype(q_ref.dtype)
        return h_new

    hout_ref[...] = lax.fori_loop(0, t_chunk, body, hout_ref[...], unroll=True)


# ---------------------------------------------------------------------------
# Wrappers
# ---------------------------------------------------------------------------
def rnn_agent_forward(inputs, hidden_state, params, use_rnn=True):
    """Mirrors RNNAgent.forward for a single step: returns (q [B,5], h [B,128]).

    NOTE: do not call this per-timestep inside a loop — use rnn_agent_rollout,
    which keeps the ~230 KiB of weights VMEM-resident across timesteps.
    """
    B = inputs.shape[0]
    x_bf = inputs.astype(jnp.bfloat16)
    h_in = hidden_state.reshape(-1, HIDDEN_DIM).astype(jnp.float32)

    full = lambda a: pl.BlockSpec(a.shape, lambda: (0,) * a.ndim)

    out_shape = (jax.ShapeDtypeStruct((B, Q_PAD), jnp.float32),
                 jax.ShapeDtypeStruct((B, HIDDEN_DIM), jnp.float32))
    out_specs = (pl.BlockSpec((B, Q_PAD), lambda: (0, 0)),
                 pl.BlockSpec((B, HIDDEN_DIM), lambda: (0, 0)))

    if use_rnn:
        args = (x_bf, h_in,
                params["w1"], params["b1"],
                params["w_rz"], params["b_rz"],
                params["w_ihn"], params["b_ihn"],
                params["w_hhn"], params["b_hhn"],
                params["w2"], params["b2"])
        kernel = _gru_agent_kernel
    else:
        # Hidden state is unused in this branch: don't DMA it at all.
        args = (x_bf,
                params["w1"], params["b1"],
                params["w_r"], params["b_r"],
                params["w2"], params["b2"])
        kernel = _mlp_agent_kernel

    q_pad, h = pl.pallas_call(
        kernel,
        out_shape=out_shape,
        in_specs=[full(a) for a in args],
        out_specs=out_specs,
    )(*args)
    return q_pad[:, :N_ACTIONS], h


def rnn_agent_rollout(inputs_seq, hidden_state, params, t_chunk=None):
    """T GRU steps in one pallas_call (weights DMA'd once, time axis chunked).

    inputs_seq: [T, B, input_shape]. Returns (q [T,B,5] f32, h_final [B,128] f32).
    Semantically identical to calling rnn_agent_forward T times with use_rnn=True.
    """
    T, B, d_in = inputs_seq.shape
    h0 = hidden_state.reshape(-1, HIDDEN_DIM).astype(jnp.float32)
    assert h0.shape[0] == B
    x_bf = inputs_seq.astype(jnp.bfloat16)

    if t_chunk is None:
        t_chunk = next(tc for tc in T_CHUNK_CANDIDATES if T % tc == 0)
    assert T % t_chunk == 0
    num_t = T // t_chunk

    # Batch-block "parallel" axis (v7x 2nd TensorCore). Only when blocks keep >=16
    # sublanes so both the bf16 x/q blocks and f32 h blocks stay tile-friendly.
    num_b = 2 if (B % 32 == 0) else 1
    b_blk = B // num_b

    resident = lambda a: pl.BlockSpec(a.shape, lambda b, t: (0,) * a.ndim)

    grid_spec = pltpu.PrefetchScalarGridSpec(
        num_scalar_prefetch=0,
        grid=(num_b, num_t),
        in_specs=[
            pl.BlockSpec((t_chunk, b_blk, d_in), lambda b, t: (t, b, 0)),    # x chunk
            pl.BlockSpec((b_blk, HIDDEN_DIM), lambda b, t: (b, 0)),          # h0
            resident(params["w1"]), resident(params["b1"]),
            resident(params["w_rz"]), resident(params["b_rz"]),
            resident(params["w_ihn"]), resident(params["b_ihn"]),
            resident(params["w_hhn"]), resident(params["b_hhn"]),
            resident(params["w2"]), resident(params["b2"]),
        ],
        out_specs=[
            pl.BlockSpec((t_chunk, b_blk, Q_PAD), lambda b, t: (t, b, 0)),   # q chunk
            pl.BlockSpec((b_blk, HIDDEN_DIM), lambda b, t: (b, 0)),          # h carry
        ],
    )

    q_pad, h = pl.pallas_call(
        _gru_rollout_kernel,
        out_shape=(jax.ShapeDtypeStruct((T, B, Q_PAD), jnp.bfloat16),
                   jax.ShapeDtypeStruct((B, HIDDEN_DIM), jnp.float32)),
        grid_spec=grid_spec,
        compiler_params=pltpu.CompilerParams(
            dimension_semantics=("parallel", "arbitrary")),
    )(x_bf, h0,
      params["w1"], params["b1"], params["w_rz"], params["b_rz"],
      params["w_ihn"], params["b_ihn"], params["w_hhn"], params["b_hhn"],
      params["w2"], params["b2"])

    return q_pad[:, :, :N_ACTIONS].astype(jnp.float32), h


# ---------------------------------------------------------------------------
# Deterministic synthetic parameters
#   raw: f32, PyTorch-equivalent layout (transposed to [in, out])
#   params: kernel layout (bf16 weights, rz-fused gates, padded fc2, f32 biases)
# ---------------------------------------------------------------------------
def make_params(key, input_shape):
    ks = jax.random.split(key, 10)
    s = 0.05
    H = HIDDEN_DIM
    wdt = jnp.bfloat16

    raw = {
        "w1": s * jax.random.normal(ks[0], (input_shape, H), jnp.float32),
        "b1": s * jax.random.normal(ks[1], (1, H), jnp.float32),
        "w_ih": s * jax.random.normal(ks[2], (H, 3 * H), jnp.float32),
        "b_ih": s * jax.random.normal(ks[3], (1, 3 * H), jnp.float32),
        "w_hh": s * jax.random.normal(ks[4], (H, 3 * H), jnp.float32),
        "b_hh": s * jax.random.normal(ks[5], (1, 3 * H), jnp.float32),
        "w_r": s * jax.random.normal(ks[6], (H, H), jnp.float32),
        "b_r": s * jax.random.normal(ks[7], (1, H), jnp.float32),
        "w2": s * jax.random.normal(ks[8], (H, N_ACTIONS), jnp.float32),
        "b2": s * jax.random.normal(ks[9], (1, N_ACTIONS), jnp.float32),
    }

    w2_pad = jnp.zeros((H, Q_PAD), jnp.float32).at[:, :N_ACTIONS].set(raw["w2"])
    b2_pad = jnp.zeros((1, Q_PAD), jnp.float32).at[:, :N_ACTIONS].set(raw["b2"])

    params = {
        "w1": raw["w1"].astype(wdt),
        "b1": raw["b1"],
        # rz K-fusion: [xh | h] @ w_rz ; bias pre-summed (byte-neutral vs 2x(H,3H))
        "w_rz": jnp.concatenate([raw["w_ih"][:, :2 * H], raw["w_hh"][:, :2 * H]],
                                axis=0).astype(wdt),
        "b_rz": raw["b_ih"][:, :2 * H] + raw["b_hh"][:, :2 * H],
        # n gate stays split (needs gi_n and gh_n separately)
        "w_ihn": raw["w_ih"][:, 2 * H:].astype(wdt),
        "b_ihn": raw["b_ih"][:, 2 * H:],
        "w_hhn": raw["w_hh"][:, 2 * H:].astype(wdt),
        "b_hhn": raw["b_hh"][:, 2 * H:],
        # use_rnn=False branch
        "w_r": raw["w_r"].astype(wdt),
        "b_r": raw["b_r"],
        # fc2 zero-padded to 128 output lanes (lane-dense stores)
        "w2": w2_pad.astype(wdt),
        "b2": b2_pad,
    }
    return params, raw


# ---------------------------------------------------------------------------
# References
# ---------------------------------------------------------------------------
def _ref_forward(inputs, hidden_state, p, use_rnn=True):
    """Same bf16/fused math as the kernels (tight-tolerance reference)."""
    h_in = hidden_state.reshape(-1, HIDDEN_DIM).astype(jnp.float32)
    if use_rnn:
        q, h = _gru_step_fused(inputs, h_in, p["w1"], p["b1"], p["w_rz"], p["b_rz"],
                               p["w_ihn"], p["b_ihn"], p["w_hhn"], p["b_hhn"],
                               p["w2"], p["b2"])
    else:
        q, h = _mlp_step(inputs, p["w1"], p["b1"], p["w_r"], p["b_r"], p["w2"], p["b2"])
    return q[:, :N_ACTIONS], h


def _ref_rollout(inputs_seq, hidden_state, p):
    h = hidden_state.reshape(-1, HIDDEN_DIM).astype(jnp.float32)
    qs = []
    for t in range(inputs_seq.shape[0]):
        q, h = _gru_step_fused(inputs_seq[t], h, p["w1"], p["b1"], p["w_rz"], p["b_rz"],
                               p["w_ihn"], p["b_ihn"], p["w_hhn"], p["b_hhn"],
                               p["w2"], p["b2"])
        qs.append(q[:, :N_ACTIONS])
    return jnp.stack(qs), h


def _ref_forward_f32(inputs, hidden_state, raw, use_rnn=True):
    """Unfused f32 PyTorch-semantics reference (validates the rz fusion)."""
    H = HIDDEN_DIM
    x = inputs.astype(jnp.float32)
    h = hidden_state.reshape(-1, H).astype(jnp.float32)
    xh = jnp.maximum(x @ raw["w1"] + raw["b1"], 0.0)
    if use_rnn:
        gi = xh @ raw["w_ih"] + raw["b_ih"]
        gh = h @ raw["w_hh"] + raw["b_hh"]
        r = jax.nn.sigmoid(gi[:, 0:H] + gh[:, 0:H])
        z = jax.nn.sigmoid(gi[:, H:2 * H] + gh[:, H:2 * H])
        n = jnp.tanh(gi[:, 2 * H:] + r * gh[:, 2 * H:])
        h_new = (1.0 - z) * n + z * h
    else:
        h_new = jnp.maximum(xh @ raw["w_r"] + raw["b_r"], 0.0)
    q = h_new @ raw["w2"] + raw["b2"]
    return q, h_new


# ---------------------------------------------------------------------------
if __name__ == "__main__":
    key = jax.random.PRNGKey(0)
    k_in, k_h, k_p, k_seq, k_seq2, k_h2 = jax.random.split(key, 6)

    B = 8
    INPUT_SHAPE = 64
    T = 32

    inputs = jax.random.normal(k_in, (B, INPUT_SHAPE), jnp.float32)
    hidden_state = jax.random.normal(k_h, (B, HIDDEN_DIM), jnp.float32)
    params, raw = make_params(k_p, INPUT_SHAPE)

    # --- single step, use_rnn=True (GRUCell) ---
    q, h = jax.block_until_ready(rnn_agent_forward(inputs, hidden_state, params, use_rnn=True))
    q_ref, h_ref = _ref_forward(inputs, hidden_state, params, use_rnn=True)
    assert jnp.allclose(q, q_ref, atol=1e-3, rtol=1e-3)
    assert jnp.allclose(h, h_ref, atol=1e-3, rtol=1e-3)
    assert q.shape == (B, N_ACTIONS) and h.shape == (B, HIDDEN_DIM)
    # fusion / bf16 vs unfused-f32 PyTorch semantics
    qf, hf = _ref_forward_f32(inputs, hidden_state, raw, use_rnn=True)
    assert jnp.allclose(q, qf, atol=2e-2, rtol=2e-2)
    assert jnp.allclose(h, hf, atol=2e-2, rtol=2e-2)

    # --- single step, use_rnn=False (Linear + ReLU) ---
    q2, h2 = jax.block_until_ready(rnn_agent_forward(inputs, hidden_state, params, use_rnn=False))
    q2_ref, h2_ref = _ref_forward(inputs, hidden_state, params, use_rnn=False)
    assert jnp.allclose(q2, q2_ref, atol=1e-3, rtol=1e-3)
    assert jnp.allclose(h2, h2_ref, atol=1e-3, rtol=1e-3)
    q2f, h2f = _ref_forward_f32(inputs, hidden_state, raw, use_rnn=False)
    assert jnp.allclose(q2, q2f, atol=2e-2, rtol=2e-2)

    # --- T-step rollout (time-chunked grid, weights VMEM-resident) ---
    seq = jax.random.normal(k_seq, (T, B, INPUT_SHAPE), jnp.float32)
    q3, h3 = jax.block_until_ready(rnn_agent_rollout(seq, hidden_state, params))
    q3_ref, h3_ref = _ref_rollout(seq, hidden_state, params)
    assert q3.shape == (T, B, N_ACTIONS) and h3.shape == (B, HIDDEN_DIM)
    assert jnp.allclose(q3, q3_ref, atol=1e-2, rtol=1e-2)   # q is bf16-stored
    assert jnp.allclose(h3, h3_ref, atol=1e-2, rtol=1e-2)

    # --- rollout exercising the batch-parallel axis (B=32 -> 2 batch blocks) ---
    B2, T2 = 32, 8
    seq2 = jax.random.normal(k_seq2, (T2, B2, INPUT_SHAPE), jnp.float32)
    hidden2 = jax.random.normal(k_h2, (B2, HIDDEN_DIM), jnp.float32)
    q4, h4 = jax.block_until_ready(rnn_agent_rollout(seq2, hidden2, params))
    q4_ref, h4_ref = _ref_rollout(seq2, hidden2, params)
    assert jnp.allclose(q4, q4_ref, atol=1e-2, rtol=1e-2)
    assert jnp.allclose(h4, h4_ref, atol=1e-2, rtol=1e-2)

    print("KERNEL_OK")
</pallas_src>

<mosaic_0001>
module attributes {stable_mosaic.version = 11 : i64} {
  func.func @_gru_agent_kernel(%arg0: memref<8x64xbf16, #tpu.memory_space<vmem>>, %arg1: memref<8x128xf32, #tpu.memory_space<vmem>>, %arg2: memref<64x128xbf16, #tpu.memory_space<vmem>>, %arg3: memref<1x128xf32, #tpu.memory_space<vmem>>, %arg4: memref<256x256xbf16, #tpu.memory_space<vmem>>, %arg5: memref<1x256xf32, #tpu.memory_space<vmem>>, %arg6: memref<128x128xbf16, #tpu.memory_space<vmem>>, %arg7: memref<1x128xf32, #tpu.memory_space<vmem>>, %arg8: memref<128x128xbf16, #tpu.memory_space<vmem>>, %arg9: memref<1x128xf32, #tpu.memory_space<vmem>>, %arg10: memref<128x128xbf16, #tpu.memory_space<vmem>>, %arg11: memref<1x128xf32, #tpu.memory_space<vmem>>, %arg12: memref<8x128xf32, #tpu.memory_space<vmem>>, %arg13: memref<8x128xf32, #tpu.memory_space<vmem>>) attributes {dimension_semantics = [], scalar_prefetch = 0 : i64, scratch_operands = 0 : i64, tpu.core_type = #tpu.core_type<tc>} {
    %c0 = arith.constant 0 : index
    %c0_0 = arith.constant 0 : index
    %0 = vector.load %arg0[%c0, %c0_0] : memref<8x64xbf16, #tpu.memory_space<vmem>>, vector<8x64xbf16>
    %c0_1 = arith.constant 0 : index
    %c0_2 = arith.constant 0 : index
    %1 = vector.load %arg1[%c0_1, %c0_2] : memref<8x128xf32, #tpu.memory_space<vmem>>, vector<8x128xf32>
    %c0_3 = arith.constant 0 : index
    %c0_4 = arith.constant 0 : index
    %2 = vector.load %arg2[%c0_3, %c0_4] : memref<64x128xbf16, #tpu.memory_space<vmem>>, vector<64x128xbf16>
    %c0_5 = arith.constant 0 : index
    %c0_6 = arith.constant 0 : index
    %3 = vector.load %arg3[%c0_5, %c0_6] : memref<1x128xf32, #tpu.memory_space<vmem>>, vector<1x128xf32>
    %c0_7 = arith.constant 0 : index
    %c0_8 = arith.constant 0 : index
    %4 = vector.load %arg4[%c0_7, %c0_8] : memref<256x256xbf16, #tpu.memory_space<vmem>>, vector<256x256xbf16>
    %c0_9 = arith.constant 0 : index
    %c0_10 = arith.constant 0 : index
    %5 = vector.load %arg5[%c0_9, %c0_10] : memref<1x256xf32, #tpu.memory_space<vmem>>, vector<1x256xf32>
    %c0_11 = arith.constant 0 : index
    %c0_12 = arith.constant 0 : index
    %6 = vector.load %arg6[%c0_11, %c0_12] : memref<128x128xbf16, #tpu.memory_space<vmem>>, vector<128x128xbf16>
    %c0_13 = arith.constant 0 : index
    %c0_14 = arith.constant 0 : index
    %7 = vector.load %arg7[%c0_13, %c0_14] : memref<1x128xf32, #tpu.memory_space<vmem>>, vector<1x128xf32>
    %c0_15 = arith.constant 0 : index
    %c0_16 = arith.constant 0 : index
    %8 = vector.load %arg8[%c0_15, %c0_16] : memref<128x128xbf16, #tpu.memory_space<vmem>>, vector<128x128xbf16>
    %c0_17 = arith.constant 0 : index
    %c0_18 = arith.constant 0 : index
    %9 = vector.load %arg9[%c0_17, %c0_18] : memref<1x128xf32, #tpu.memory_space<vmem>>, vector<1x128xf32>
    %c0_19 = arith.constant 0 : index
    %c0_20 = arith.constant 0 : index
    %10 = vector.load %arg10[%c0_19, %c0_20] : memref<128x128xbf16, #tpu.memory_space<vmem>>, vector<128x128xbf16>
    %c0_21 = arith.constant 0 : index
    %c0_22 = arith.constant 0 : index
    %11 = vector.load %arg11[%c0_21, %c0_22] : memref<1x128xf32, #tpu.memory_space<vmem>>, vector<1x128xf32>
    %cst = arith.constant dense<0.000000e+00> : vector<8x128xf32>
    %12 = tpu.matmul %0, %2, %cst {dimension_numbers = #tpu.dot_dimension_numbers<[1], [0], [0], [1], [0, 0, 1, 1], [], []>} : vector<8x64xbf16>, vector<64x128xbf16>, vector<8x128xf32> -> vector<8x128xf32>
    %13 = vector.broadcast %3 : vector<1x128xf32> to vector<8x128xf32>
    %14 = arith.addf %12, %13 : vector<8x128xf32>
    %cst_23 = arith.constant 0.000000e+00 : f32
    %15 = vector.broadcast %cst_23 : f32 to vector<8x128xf32>
    %16 = arith.maximumf %14, %15 : vector<8x128xf32>
    %17 = arith.truncf %16 : vector<8x128xf32> to vector<8x128xbf16>
    %18 = arith.truncf %1 : vector<8x128xf32> to vector<8x128xbf16>
    %19 = tpu.concatenate %17, %18 in 1 : vector<8x128xbf16>, vector<8x128xbf16> -> vector<8x256xbf16>
    %cst_24 = arith.constant dense<0.000000e+00> : vector<8x256xf32>
    %20 = tpu.matmul %19, %4, %cst_24 {dimension_numbers = #tpu.dot_dimension_numbers<[1], [0], [0], [1], [0, 0, 1, 1], [], []>} : vector<8x256xbf16>, vector<256x256xbf16>, vector<8x256xf32> -> vector<8x256xf32>
    %21 = vector.broadcast %5 : vector<1x256xf32> to vector<8x256xf32>
    %22 = arith.addf %20, %21 : vector<8x256xf32>
    %23 = vector.extract_strided_slice %22 {offsets = [0, 0], sizes = [8, 128], strides = [1, 1]} : vector<8x256xf32> to vector<8x128xf32>
    %24 = arith.negf %23 : vector<8x128xf32>
    %25 = math.exp %24 : vector<8x128xf32>
    %cst_25 = arith.constant 1.000000e+00 : f32
    %26 = vector.broadcast %cst_25 : f32 to vector<8x128xf32>
    %27 = arith.addf %26, %25 : vector<8x128xf32>
    %28 = arith.divf %26, %27 : vector<8x128xf32>
    %29 = vector.extract_strided_slice %22 {offsets = [0, 128], sizes = [8, 128], strides = [1, 1]} : vector<8x256xf32> to vector<8x128xf32>
    %30 = arith.negf %29 : vector<8x128xf32>
    %31 = math.exp %30 : vector<8x128xf32>
    %cst_26 = arith.constant 1.000000e+00 : f32
    %32 = vector.broadcast %cst_26 : f32 to vector<8x128xf32>
    %33 = arith.addf %32, %31 : vector<8x128xf32>
    %34 = arith.divf %32, %33 : vector<8x128xf32>
    %cst_27 = arith.constant dense<0.000000e+00> : vector<8x128xf32>
    %35 = tpu.matmul %17, %6, %cst_27 {dimension_numbers = #tpu.dot_dimension_numbers<[1], [0], [0], [1], [0, 0, 1, 1], [], []>} : vector<8x128xbf16>, vector<128x128xbf16>, vector<8x128xf32> -> vector<8x128xf32>
    %36 = vector.broadcast %7 : vector<1x128xf32> to vector<8x128xf32>
    %37 = arith.addf %35, %36 : vector<8x128xf32>
    %cst_28 = arith.constant dense<0.000000e+00> : vector<8x128xf32>
    %38 = tpu.matmul %18, %8, %cst_28 {dimension_numbers = #tpu.dot_dimension_numbers<[1], [0], [0], [1], [0, 0, 1, 1], [], []>} : vector<8x128xbf16>, vector<128x128xbf16>, vector<8x128xf32> -> vector<8x128xf32>
    %39 = vector.broadcast %9 : vector<1x128xf32> to vector<8x128xf32>
    %40 = arith.addf %38, %39 : vector<8x128xf32>
    %41 = arith.mulf %28, %40 : vector<8x128xf32>
    %42 = arith.addf %37, %41 : vector<8x128xf32>
    %43 = math.tanh %42 : vector<8x128xf32>
    %cst_29 = arith.constant 1.000000e+00 : f32
    %44 = vector.broadcast %cst_29 : f32 to vector<8x128xf32>
    %45 = arith.subf %44, %34 : vector<8x128xf32>
    %46 = arith.mulf %45, %43 : vector<8x128xf32>
    %47 = arith.mulf %34, %1 : vector<8x128xf32>
    %48 = arith.addf %46, %47 : vector<8x128xf32>
    %49 = arith.truncf %48 : vector<8x128xf32> to vector<8x128xbf16>
    %cst_30 = arith.constant dense<0.000000e+00> : vector<8x128xf32>
    %50 = tpu.matmul %49, %10, %cst_30 {dimension_numbers = #tpu.dot_dimension_numbers<[1], [0], [0], [1], [0, 0, 1, 1], [], []>} : vector<8x128xbf16>, vector<128x128xbf16>, vector<8x128xf32> -> vector<8x128xf32>
    %51 = vector.broadcast %11 : vector<1x128xf32> to vector<8x128xf32>
    %52 = arith.addf %50, %51 : vector<8x128xf32>
    %c0_31 = arith.constant 0 : index
    %c0_32 = arith.constant 0 : index
    %53 = vector.load %arg12[%c0_31, %c0_32] : memref<8x128xf32, #tpu.memory_space<vmem>>, vector<8x128xf32>
    tpu.vector_store %arg12[%c0_31, %c0_32], %52 {strides = array<i32>} : memref<8x128xf32, #tpu.memory_space<vmem>>, vector<8x128xf32>,
    %c0_33 = arith.constant 0 : index
    %c0_34 = arith.constant 0 : index
    %54 = vector.load %arg13[%c0_33, %c0_34] : memref<8x128xf32, #tpu.memory_space<vmem>>, vector<8x128xf32>
    tpu.vector_store %arg13[%c0_33, %c0_34], %48 {strides = array<i32>} : memref<8x128xf32, #tpu.memory_space<vmem>>, vector<8x128xf32>,
    return
  }
}

</mosaic_0001>

<bundles_post_ra>
// kernel: tpu_custom_call.1
= control target key start
LH: loop header
LB: loop body
LE: loop exit
PB: predicated region body
PF: predicated region fallthrough
CT: control target
= control target key end

     0   :  { %19 = vsyncpa [#allocation3], 0  ;;  %s1475_s0 = inlined_call_operand.hbm [shape: bf16[8,64], index: 0, kind: input, shape index: {}]   ;;  %s1476_s1 = inlined_call_operand.hbm [shape: f32[8,128], index: 1, kind: input, shape index: {}]   ;;  %s1477_s2 = inlined_call_operand.hbm [shape: bf16[64,128], index: 2, kind: input, shape index: {}]   ;;  %s1478_s3 = inlined_call_operand.vmem [shape: f32[1,128], index: 3, kind: input, shape index: {}]   ;;  %s1479_s4 = inlined_call_operand.hbm [shape: bf16[256,256], index: 4, kind: input, shape index: {}]   ;;  %s1480_s5 = inlined_call_operand.vmem [shape: f32[1,256], index: 5, kind: input, shape index: {}]   ;;  %s1481_s6 = inlined_call_operand.hbm [shape: bf16[128,128], index: 6, kind: input, shape index: {}]   ;;  %s1482_s7 = inlined_call_operand.vmem [shape: f32[1,128], index: 7, kind: input, shape index: {}]   ;;  %s1483_s8 = inlined_call_operand.hbm [shape: bf16[128,128], index: 8, kind: input, shape index: {}]   ;;  %s1484_s9 = inlined_call_operand.vmem [shape: f32[1,128], index: 9, kind: input, shape index: {}]   ;;  %s1485_s10 = inlined_call_operand.hbm [shape: bf16[128,128], index: 10, kind: input, shape index: {}]   ;;  %s1486_s11 = inlined_call_operand.vmem [shape: f32[1,128], index: 11, kind: input, shape index: {}]   ;;  %s1487_s12 = inlined_call_operand.hbm [shape: f32[8,128], index: 12, kind: output, shape index: {0}]   ;;  %s1488_s13 = inlined_call_operand.hbm [shape: f32[8,128], index: 13, kind: output, shape index: {1}]  }
   0x1   :  { %20 = vsyncpa [#allocation6], 0 }
   0x2   :  { %21 = vsyncpa [#allocation9], 0 }
   0x3   :  { %22 = vsyncpa [#allocation12], 0 }
   0x4   :  { %23 = vsyncpa [#allocation4], 0  ;;  %s41_s27 = sshll.u32 %s1476_s1, 4  ;;  %s42_s27 = int_to_ptr.hbm [resolvable:$true] %s41_s27 }
   0x5   :  { %24 = vsyncpa [#allocation16], 0  ;;  %s1344_s28 = smov [#allocation5]   ;;  %s66_s15 = sshll.u32 %s1479_s4, 4  ;;  %s67_s15 = int_to_ptr.hbm [resolvable:$true] %s66_s15 }
   0x6   :  { %s43_s29 = sshll.u32 %s1344_s28, 4  ;;  %s1345_s16 = smov [#allocation8]   ;;  %s44_s29 = int_to_ptr.vmem [resolvable:$true] %s43_s29 }
   0x7   :  { %46 = dma.hbm_to_vmem [thread:$0]  %s42_s27, 128, %s44_s29, [#allocation6]  }
   0x8   :  { %s68_s17 = sshll.u32 %s1345_s16, 4  ;;  %s1346_s18 = smov 128   ;;  %s69_s17 = int_to_ptr.vmem [resolvable:$true] %s68_s17 }
   0x9   :  { %s1347_s19 = smov 8   ;;  %s96_s1 = sshll.u32 %s1483_s8, 4  ;;  %s97_s1 = int_to_ptr.hbm [resolvable:$true] %s96_s1 }
   0xa   :  { %74 = dma.hbm_to_vmem [thread:$0]  %s67_s15, 4096, %s69_s17, [#allocation9], %s1346_s18, %s1346_s18, %s1347_s19  }
   0xb   :  { %s1348_s22 = smov [#allocation11]   ;;  %s30_s4 = sshll.u32 %s1475_s0, 4  ;;  %s31_s4 = int_to_ptr.hbm [resolvable:$true] %s30_s4 }
   0xc   :  { %s98_s23 = sshll.u32 %s1348_s22, 4  ;;  %s1349_s26 = smov 64   ;;  %s99_s23 = int_to_ptr.vmem [resolvable:$true] %s98_s23 }
   0xd   :  { %s1350_s27 = smov 4   ;;  %s1351_s28 = smov [#allocation2]  }
   0xe   :  { %104 = dma.hbm_to_vmem [thread:$0]  %s97_s1, 1024, %s99_s23, [#allocation12], %s1349_s26, %s1349_s26, %s1350_s27  }
   0xf   :  { %s32_s29 = sshll.u32 %s1351_s28, 4  ;;  %s51_s15 = sshll.u32 %s1477_s2, 4  ;;  %s33_s29 = int_to_ptr.vmem [resolvable:$true] %s32_s29  ;;  %s52_s15 = int_to_ptr.hbm [resolvable:$true] %s51_s15 }
  0x10   :  { %35 = dma.hbm_to_vmem [thread:$0]  %s31_s4, 64, %s33_s29, [#allocation3]  }
  0x11   :  { %s81_s17 = sshll.u32 %s1481_s6, 4  ;;  %s1352_s18 = smov [#allocation7]   ;;  %s82_s17 = int_to_ptr.hbm [resolvable:$true] %s81_s17 }
  0x12   :  { %s53_s19 = sshll.u32 %s1352_s18, 4  ;;  %s1353_s0 = smov [#allocation10]   ;;  %s54_s19 = int_to_ptr.vmem [resolvable:$true] %s53_s19 }
  0x13   :  { %59 = dma.hbm_to_vmem [thread:$0]  %s52_s15, 512, %s54_s19, [#allocation6], %s1349_s26, %s1349_s26, %s1350_s27  }
  0x14   :  { %s83_s20 = sshll.u32 %s1353_s0, 4  ;;  %s111_s22 = sshll.u32 %s1485_s10, 4  ;;  %s84_s20 = int_to_ptr.vmem [resolvable:$true] %s83_s20  ;;  %s112_s22 = int_to_ptr.hbm [resolvable:$true] %s111_s22 }
  0x15   :  { %89 = dma.hbm_to_vmem [thread:$0]  %s82_s17, 1024, %s84_s20, [#allocation9], %s1349_s26, %s1349_s26, %s1350_s27  }
  0x16   :  { %s1354_s2 = smov [#allocation13]  }
  0x17   :  { %s113_s23 = sshll.u32 %s1354_s2, 4  ;;  %s114_s23 = int_to_ptr.vmem [resolvable:$true] %s113_s23 }
  0x18   :  { %119 = dma.hbm_to_vmem [thread:$0]  %s112_s22, 1024, %s114_s23, [#allocation12], %s1349_s26, %s1349_s26, %s1350_s27  }
  0x19   :  { %1332 = dma.done.wait [#allocation3], 64  }
  0x1a   :  { %1333 = vsyncadd [#allocation3], 4294967232 }
  0x1b   :  { %1334 = dma.done.wait [#allocation6], 640  }
  0x1c   :  { %1335 = vsyncadd [#allocation6], 4294966656 }
  0x1d   :  { %1336 = dma.done.wait [#allocation9], 5120  }
  0x1e   :  { %1337 = vsyncadd [#allocation9], 4294962176 }
  0x1f   :  { %1338 = dma.done.wait [#allocation12], 2048  }
  0x20   :  { %1339 = vsyncadd [#allocation12], 4294965248  ;;  %v1032_v0 = vld [vmem:[#allocation7 + $0x18] sm:$0xff]  ;;  %v1031_v1 = vld [vmem:[#allocation7 + $0x10] sm:$0xff]  ;;  %vm273_vm0 = vcmask 523264   ;;  %s768_s29 = sshll.u32 %s1488_s13, 4  ;;  %s769_s29 = int_to_ptr.hbm [resolvable:$true] %s768_s29 }
  0x21   :  { %v861_v2 = vld [vmem:[#allocation8 + $0x70] sm:$0xf]  ;;  %281 = vmatpush.bf16.msra.mxu0 %v1032_v0  ;;  %v1048_v3 = vld [vmem:[#allocation8 + $0x74] sm:$0xf0]  ;;  %v853_v8 = vld [vmem:[#allocation8 + $0x60] sm:$0xf] }
  0x22   :  { %v925_v4 = vld [vmem:[#allocation8 + $0xf0] sm:$0xf]  ;;  %v1064_v5 = vld [vmem:[#allocation8 + $0xf4] sm:$0xf0]  ;;  %v862_v6 = vor.u32 %v1048_v3, %v861_v2  ;;  %v1046_v9 = vld [vmem:[#allocation8 + $0x64] sm:$0xf0] }
  0x23   :  { %v926_v7 = vor.u32 %v1064_v5, %v925_v4  ;;  %v917_v10 = vld [vmem:[#allocation8 + $0xe0] sm:$0xf]  ;;  %v1062_v11 = vld [vmem:[#allocation8 + $0xe4] sm:$0xf0]  ;;  %v854_v13 = vor.u32 %v1046_v9, %v853_v8  ;;  %v845_v15 = vld [vmem:[#allocation8 + $0x50] sm:$0xf] }
  0x24   :  { %v1030_v12 = vld [vmem:[#allocation7 + $0x8] sm:$0xff]  ;;  %458 = vmatpush.bf16.msra.mxu1 %v862_v6  ;;  %v918_v14 = vor.u32 %v1062_v11, %v917_v10  ;;  %v1044_v16 = vld [vmem:[#allocation8 + $0x54] sm:$0xf0]  ;;  %v909_v17 = vld [vmem:[#allocation8 + $0xd0] sm:$0xf]  ;;  %s1356_s15 = smov [#allocation14]  }
  0x25   :  { %471 = vmatpush.bf16.msra.mxu2 %v926_v7  ;;  %282 = vmatpush.bf16.msra.mxu0 %v1031_v1  ;;  %v1060_v18 = vld [vmem:[#allocation8 + $0xd4] sm:$0xf0]  ;;  %v1047_v19 = vld [vmem:[#allocation8 + $0x74] sm:$0xf]  ;;  %v863_v20 = vld [vmem:[#allocation8 + $0x78] sm:$0xf0]  ;;  %v846_v23 = vor.u32 %v1044_v16, %v845_v15 }
  0x26   :  { %v1029_v21 = vld [vmem:[#allocation7] sm:$0xff]  ;;  %v866_v22 = vor.u32 %v1047_v19, %v863_v20  ;;  %v910_v24 = vor.u32 %v1060_v18, %v909_v17  ;;  %v1063_v25 = vld [vmem:[#allocation8 + $0xf4] sm:$0xf]  ;;  %v927_v26 = vld [vmem:[#allocation8 + $0xf8] sm:$0xf0]  ;;  %s755_s8 = sshll.u32 %s1356_s15, 4  ;;  %s756_s8 = int_to_ptr.vmem [resolvable:$true] %s755_s8 }
  0x27   :  { %v1045_v27 = vld [vmem:[#allocation8 + $0x64] sm:$0xf]  ;;  %v837_v28 = vld [vmem:[#allocation8 + $0x40] sm:$0xf]  ;;  %v1042_v29 = vld [vmem:[#allocation8 + $0x44] sm:$0xf0]  ;;  %v930_v33 = vor.u32 %v1063_v25, %v927_v26 }
  0x28   :  { %459 = vmatpush.bf16.msra.mxu1 %v854_v13  ;;  %484 = vmatpush.bf16.msra.mxu3 %v866_v22  ;;  %v855_v30 = vld [vmem:[#allocation8 + $0x68] sm:$0xf0]  ;;  %v901_v31 = vld [vmem:[#allocation8 + $0xc0] sm:$0xf]  ;;  %v1058_v32 = vld [vmem:[#allocation8 + $0xc4] sm:$0xf0]  ;;  %v838_v40 = vor.u32 %v1042_v29, %v837_v28 }
  0x29   :  { %472 = vmatpush.bf16.msra.mxu2 %v918_v14  ;;  %283 = vmatpush.bf16.msra.mxu0 %v1030_v12  ;;  %v858_v34 = vor.u32 %v1045_v27, %v855_v30  ;;  %v1061_v35 = vld [vmem:[#allocation8 + $0xe4] sm:$0xf]  ;;  %v919_v36 = vld [vmem:[#allocation8 + $0xe8] sm:$0xf0]  ;;  %v1043_v37 = vld [vmem:[#allocation8 + $0x54] sm:$0xf]  ;;  %v902_v41 = vor.u32 %v1058_v32, %v901_v31 }
  0x2a   :  { %v847_v38 = vld [vmem:[#allocation8 + $0x58] sm:$0xf0]  ;;  %v151_v39 = vld [vmem:[#allocation2] sm:$0xf]  ;;  %v829_v42 = vld [vmem:[#allocation8 + $0x30] sm:$0xf]  ;;  %v922_v47 = vor.u32 %v1061_v35, %v919_v36 }
  0x2b   :  { %v1040_v43 = vld [vmem:[#allocation8 + $0x34] sm:$0xf0]  ;;  %v893_v44 = vld [vmem:[#allocation8 + $0xb0] sm:$0xf]  ;;  %v850_v45 = vor.u32 %v1043_v37, %v847_v38  ;;  %v1041_v48 = vld [vmem:[#allocation8 + $0x44] sm:$0xf] }
  0x2c   :  { %460 = vmatpush.bf16.msra.mxu1 %v846_v23  ;;  %485 = vmatpush.bf16.msra.mxu3 %v858_v34  ;;  %v1056_v46 = vld [vmem:[#allocation8 + $0xb4] sm:$0xf0]  ;;  %v839_v49 = vld [vmem:[#allocation8 + $0x48] sm:$0xf0]  ;;  %v1059_v50 = vld [vmem:[#allocation8 + $0xd4] sm:$0xf]  ;;  %v830_v52 = vor.u32 %v1040_v43, %v829_v42 }
  0x2d   :  { %473 = vmatpush.bf16.msra.mxu2 %v910_v24  ;;  %284 = vmatpush.bf16.msra.mxu0 %v1029_v21  ;;  %v911_v51 = vld [vmem:[#allocation8 + $0xd8] sm:$0xf0]  ;;  %v894_v53 = vor.u32 %v1056_v46, %v893_v44  ;;  %v821_v54 = vld [vmem:[#allocation8 + $0x20] sm:$0xf]  ;;  %v1038_v55 = vld [vmem:[#allocation8 + $0x24] sm:$0xf0]  ;;  %v842_v57 = vor.u32 %v1041_v48, %v839_v49 }
  0x2e   :  { %v885_v56 = vld [vmem:[#allocation8 + $0xa0] sm:$0xf]  ;;  %v1054_v58 = vld [vmem:[#allocation8 + $0xa4] sm:$0xf0]  ;;  %v914_v59 = vor.u32 %v1059_v50, %v911_v51  ;;  %v1039_v60 = vld [vmem:[#allocation8 + $0x34] sm:$0xf]  ;;  %v822_v1 = vor.u32 %v1038_v55, %v821_v54 }
  0x2f   :  { %v831_v61 = vld [vmem:[#allocation8 + $0x38] sm:$0xf0]  ;;  %v813_v62 = vld [vmem:[#allocation8 + $0x10] sm:$0xf]  ;;  %v1057_v63 = vld [vmem:[#allocation8 + $0xc4] sm:$0xf]  ;;  %v886_v5 = vor.u32 %v1054_v58, %v885_v56 }
  0x30   :  { %802 = vmatmul.msk.bf16.vlgmr.msra.gmra.mxu0 %vm273_vm0, %v151_v39  ;;  %461 = vmatpush.bf16.msra.mxu1 %v838_v40  ;;  %v903_v0 = vld [vmem:[#allocation8 + $0xc8] sm:$0xf0]  ;;  %v1036_v2 = vld [vmem:[#allocation8 + $0x14] sm:$0xf0]  ;;  %v877_v3 = vld [vmem:[#allocation8 + $0x90] sm:$0xf]  ;;  %v834_v6 = vor.u32 %v1039_v60, %v831_v61 }
  0x31   :  { %497 = vmatpush.bf16.msrb.mxu0 %v930_v33  ;;  %474 = vmatpush.bf16.msra.mxu2 %v902_v41  ;;  %v1052_v4 = vld [vmem:[#allocation8 + $0x94] sm:$0xf0]  ;;  %v1037_v7 = vld [vmem:[#allocation8 + $0x24] sm:$0xf]  ;;  %v906_v8 = vor.u32 %v1057_v63, %v903_v0  ;;  %v823_v9 = vld [vmem:[#allocation8 + $0x28] sm:$0xf0]  ;;  %v814_v12 = vor.u32 %v1036_v2, %v813_v62 }
  0x32   :  { %486 = vmatpush.bf16.msra.mxu3 %v850_v45  ;;  %v1055_v10 = vld [vmem:[#allocation8 + $0xb4] sm:$0xf]  ;;  %v895_v11 = vld [vmem:[#allocation8 + $0xb8] sm:$0xf0]  ;;  %v878_v13 = vor.u32 %v1052_v4, %v877_v3  ;;  %v805_v14 = vld [vmem:[#allocation8] sm:$0xf]  ;;  %v826_v16 = vor.u32 %v1037_v7, %v823_v9 }
  0x33   :  { %v1034_v15 = vld [vmem:[#allocation8 + $0x4] sm:$0xf0]  ;;  %v869_v17 = vld [vmem:[#allocation8 + $0x80] sm:$0xf]  ;;  %v898_v19 = vor.u32 %v1055_v10, %v895_v11  ;;  %v1053_v20 = vld [vmem:[#allocation8 + $0xa4] sm:$0xf] }
  0x34   :  { %462 = vmatpush.bf16.msra.mxu1 %v830_v52  ;;  %v1050_v18 = vld [vmem:[#allocation8 + $0x84] sm:$0xf0]  ;;  %v887_v21 = vld [vmem:[#allocation8 + $0xa8] sm:$0xf0]  ;;  %v806_v22 = vor.u32 %v1034_v15, %v805_v14  ;;  %v1072_v24 = vld [vmem:[#allocation10 + $0x38] sm:$0xff]  ;;  %s757_s18 = sshll.u32 %s1487_s12, 4  ;;  %s758_s18 = int_to_ptr.hbm [resolvable:$true] %s757_s18 }
  0x35   :  { %498 = vmatpush.bf16.msrb.mxu0 %v922_v47  ;;  %475 = vmatpush.bf16.msra.mxu2 %v894_v53  ;;  %v870_v23 = vor.u32 %v1050_v18, %v869_v17  ;;  %v1449_v25 = vld [vmem:[#allocation5] sm:$0xff]  ;;  %v890_v27 = vor.u32 %v1053_v20, %v887_v21  ;;  %v1071_v29 = vld [vmem:[#allocation10 + $0x30] sm:$0xff]  ;;  %v1070_v34 = vld [vmem:[#allocation10 + $0x28] sm:$0xff] }
  0x36   :  { %487 = vmatpush.bf16.msra.mxu3 %v842_v57  ;;  %v1080_v26 = vld [vmem:[#allocation11 + $0x38] sm:$0xff]  ;;  %v292_v28 = vpack.c.bf16 %v1449_v25, %v1449_v25  ;;  %v1079_v30 = vld [vmem:[#allocation11 + $0x30] sm:$0xff]  ;;  %v1078_v35 = vld [vmem:[#allocation11 + $0x28] sm:$0xff] }
  0x37   :  { %v1035_v31 = vld [vmem:[#allocation8 + $0x14] sm:$0xf]  ;;  %v815_v32 = vld [vmem:[#allocation8 + $0x18] sm:$0xf0]  ;;  %v1033_v39 = vld [vmem:[#allocation8 + $0x4] sm:$0xf] }
  0x38   :  { %463 = vmatpush.bf16.msra.mxu1 %v822_v1  ;;  %v818_v33 = vor.u32 %v1035_v31, %v815_v32  ;;  %v1051_v36 = vld [vmem:[#allocation8 + $0x94] sm:$0xf]  ;;  %v879_v37 = vld [vmem:[#allocation8 + $0x98] sm:$0xf0]  ;;  %v807_v40 = vld [vmem:[#allocation8 + $0x8] sm:$0xf0] }
  0x39   :  { %499 = vmatpush.bf16.msrb.mxu0 %v914_v59  ;;  %476 = vmatpush.bf16.msra.mxu2 %v886_v5  ;;  %v882_v38 = vor.u32 %v1051_v36, %v879_v37  ;;  %v810_v41 = vor.u32 %v1033_v39, %v807_v40  ;;  %v1069_v42 = vld [vmem:[#allocation10 + $0x20] sm:$0xff]  ;;  %v871_v45 = vld [vmem:[#allocation8 + $0x88] sm:$0xf0]  ;;  %v1068_v47 = vld [vmem:[#allocation10 + $0x18] sm:$0xff] }
  0x3a   :  { %488 = vmatpush.bf16.msra.mxu3 %v834_v6  ;;  %v1077_v43 = vld [vmem:[#allocation11 + $0x20] sm:$0xff]  ;;  %v1076_v48 = vld [vmem:[#allocation11 + $0x18] sm:$0xff]  ;;  %v1067_v49 = vld [vmem:[#allocation10 + $0x10] sm:$0xff] }
  0x3b   :  { %v1049_v44 = vld [vmem:[#allocation8 + $0x84] sm:$0xf]  ;;  %v1075_v50 = vld [vmem:[#allocation11 + $0x10] sm:$0xff]  ;;  %v1066_v51 = vld [vmem:[#allocation10 + $0x8] sm:$0xff] }
  0x3c   :  { %464 = vmatpush.bf16.msra.mxu1 %v814_v12  ;;  %v874_v46 = vor.u32 %v1049_v44, %v871_v45  ;;  %v1074_v52 = vld [vmem:[#allocation11 + $0x8] sm:$0xff]  ;;  %v1065_v53 = vld [vmem:[#allocation10] sm:$0xff]  ;;  %v1102_v55 = vld [vmem:[%s1478_s3] ss:$0 sm:$0xff] }
  0x3d   :  { %500 = vmatpush.bf16.msrb.mxu0 %v906_v8  ;;  %477 = vmatpush.bf16.msra.mxu2 %v878_v13  ;;  %v1073_v54 = vld [vmem:[#allocation11] sm:$0xff]  ;;  %v1088_v1 = vld [vmem:[#allocation13 + $0x38] sm:$0xff]  ;;  %v1087_v2 = vld [vmem:[#allocation13 + $0x30] sm:$0xff] }
  0x3e   :  { %489 = vmatpush.bf16.msra.mxu3 %v826_v16  ;;  %v1086_v4 = vld [vmem:[#allocation13 + $0x28] sm:$0xff]  ;;  %v194_v5 = vld [vmem:[%s1480_s5] sm:$0x3]  ;;  %v1085_v7 = vld [vmem:[#allocation13 + $0x20] sm:$0xff] }
  0x3f   :  { %v294_v6 = vperm.slane %v194_v5, 0  ;;  %v1084_v11 = vld [vmem:[#allocation13 + $0x18] sm:$0xff]  ;;  %v295_v13 = vperm.slane %v194_v5, 1  ;;  %v1083_v15 = vld [vmem:[#allocation13 + $0x10] sm:$0xff]  ;;  %v1082_v18 = vld [vmem:[#allocation13 + $0x8] sm:$0xff] }
  0x40   :  { %465 = vmatpush.bf16.msra.mxu1 %v806_v22  ;;  %v1081_v22 = vld [vmem:[#allocation13] sm:$0xff]  ;;  %v1103_v39 = vld [vmem:[%s1482_s7] ss:$0 sm:$0xff]  ;;  %s1355_s7 = smov [#allocation15]  }
  0x41   :  { %501 = vmatpush.bf16.msrb.mxu0 %v898_v19  ;;  %478 = vmatpush.bf16.msra.mxu2 %v870_v23 }
  0x42   :  { %490 = vmatpush.bf16.msra.mxu3 %v818_v33 }
  0x44   :  { %599 = vmatpush.bf16.msrb.mxu1 %v1072_v24  ;;  %479 = vmatmul.bf16.vlgmr.msra.gmra.mxu2 %v292_v28 }
  0x45   :  { %663 = vmatpush.bf16.msrb.mxu2 %v1080_v26  ;;  %502 = vmatpush.bf16.msrb.mxu0 %v890_v27 }
  0x46   :  { %491 = vmatpush.bf16.msra.mxu3 %v810_v41 }
  0x48   :  { %600 = vmatpush.bf16.msrb.mxu1 %v1071_v29 }
  0x49   :  { %664 = vmatpush.bf16.msrb.mxu2 %v1079_v30  ;;  %503 = vmatpush.bf16.msrb.mxu0 %v882_v38 }
  0x4a   :  { %735 = vmatpush.bf16.msrb.mxu3 %v1088_v1 }
  0x4c   :  { %601 = vmatpush.bf16.msrb.mxu1 %v1070_v34  ;;  %v1104_v34 = vld [vmem:[%s1484_s9] ss:$0 sm:$0xff]  ;;  %s766_s9 = sshll.u32 %s1355_s7, 4  ;;  %s767_s9 = int_to_ptr.vmem [resolvable:$true] %s766_s9 }
  0x4d   :  { %665 = vmatpush.bf16.msrb.mxu2 %v1078_v35  ;;  %504 = vmatpush.bf16.msrb.mxu0 %v874_v46 }
  0x4e   :  { %736 = vmatpush.bf16.msrb.mxu3 %v1087_v2 }
  0x50   :  { %602 = vmatpush.bf16.msrb.mxu1 %v1069_v42  ;;  %505 = vmatmul.bf16.vlgmr.msrb.gmra.mxu0 %v292_v28 }
  0x51   :  { %666 = vmatpush.bf16.msrb.mxu2 %v1077_v43 }
  0x52   :  { %737 = vmatpush.bf16.msrb.mxu3 %v1086_v4 }
  0x54   :  { %603 = vmatpush.bf16.msrb.mxu1 %v1068_v47 }
  0x55   :  { %667 = vmatpush.bf16.msrb.mxu2 %v1076_v48 }
  0x56   :  { %738 = vmatpush.bf16.msrb.mxu3 %v1085_v7 }
  0x58   :  { %604 = vmatpush.bf16.msrb.mxu1 %v1067_v49 }
  0x59   :  { %668 = vmatpush.bf16.msrb.mxu2 %v1075_v50 }
  0x5a   :  { %739 = vmatpush.bf16.msrb.mxu3 %v1084_v11 }
  0x5c   :  { %605 = vmatpush.bf16.msrb.mxu1 %v1066_v51 }
  0x5d   :  { %669 = vmatpush.bf16.msrb.mxu2 %v1074_v52 }
  0x5e   :  { %740 = vmatpush.bf16.msrb.mxu3 %v1083_v15 }
  0x60   :  { %606 = vmatpush.bf16.msrb.mxu1 %v1065_v53 }
  0x61   :  { %670 = vmatpush.bf16.msrb.mxu2 %v1073_v54 }
  0x62   :  { %741 = vmatpush.bf16.msrb.mxu3 %v1082_v18 }
  0x64   :  { %671 = vmatmul.bf16.vlgmr.msrb.gmra.mxu2 %v292_v28 }
  0x66   :  { %742 = vmatpush.bf16.msrb.mxu3 %v1081_v22 }
  0xad   :  { %v286_v56 = vpop.f32.mrf.mxu0 }
  0xae   :  { %v287_v57 = vadd.f32 %v1102_v55, %v286_v56 }
  0xb0   :  { %v290_v58 = vmax.f32 %v287_v57, 0.0 }
  0xb2   :  { %v291_v59 = vpack.c.bf16 %v290_v58, %v290_v58 }
  0xb4   :  { %466 = vmatmul.bf16.vlgmr.msra.gmra.mxu1 %v291_v59  ;;  %492 = vmatmul.bf16.vlgmr.msra.gmra.mxu3 %v291_v59 }
  0xb5   :  { %v288_v60 = vpop.f32.mrf.mxu0 }
  0xc4   :  { %607 = vmatmul.bf16.vlgmr.msrb.gmra.mxu1 %v291_v59 }
  0xc7   :  { %v480_v61 = vpop.f32.mrf.mxu2 }
  0xcd   :  { %v506_v63 = vpop.f32.mrf.mxu0 }
  0xcf   :  { %v482_v62 = vpop.f32.mrf.mxu2 }
  0xd5   :  { %v508_v0 = vpop.f32.mrf.mxu0 }
  0xe7   :  { %v672_v3 = vpop.f32.mrf.mxu2 }
  0xe8   :  { %v673_v42 = vadd.f32 %v1104_v34, %v672_v3 }
  0xef   :  { %v674_v8 = vpop.f32.mrf.mxu2 }
 0x131   :  { %v467_v9 = vpop.f32.mrf.mxu1 }
 0x132   :  { %v468_v10 = vadd.f32 %v467_v9, %v294_v6 }
 0x134   :  { %v481_v12 = vadd.f32 %v480_v61, %v468_v10 }
 0x136   :  { %v931_v14 = vmul.f32 -1.442695, %v481_v12 }
 0x137   :  { %v493_v16 = vpop.f32.mrf.mxu3 }
 0x138   :  { %1106 = vpow2.f32 %v931_v14  ;;  %v494_v17 = vadd.f32 %v493_v16, %v295_v13 }
 0x139   :  { %v469_v19 = vpop.f32.mrf.mxu1 }
 0x13a   :  { %v507_v20 = vadd.f32 %v506_v63, %v494_v17  ;;  %v1105_v63 = vld [vmem:[%s1486_s11] ss:$0 sm:$0xff] }
 0x13c   :  { %v932_v21 = vmul.f32 -1.442695, %v507_v20 }
 0x13e   :  { %v1107_v23 = vpop.eup %1106  ;;  %1108 = vpow2.f32 %v932_v21 }
 0x13f   :  { %v513_v24 = vadd.f32 1.0, %v1107_v23  ;;  %v495_v26 = vpop.f32.mrf.mxu3 }
 0x141   :  { %1110 = vrcp.f32 %v513_v24  ;;  %v608_v27 = vpop.f32.mrf.mxu1  ;;  %v525_v35 = vand.u32 2147483648, %v513_v24  ;;  %v523_v37 = vand.u32 2147483647, %v513_v24  ;;  %vm519_vm2 = vweird.f32 %v513_v24 }
 0x142   :  { %v609_v46 = vadd.f32 %v1103_v39, %v608_v27 }
 0x143   :  { %v526_v43 = vor.u32 1.1754944e-38, %v525_v35  ;;  %vm524_vm4 = vcmp.eq.f32.partialorder %v523_v37, 8.507059e+37 }
 0x144   :  { %v1109_v28 = vpop.eup %1108 }
 0x145   :  { %v532_v29 = vadd.f32 1.0, %v1109_v28 }
 0x147   :  { %v1111_v30 = vpop.eup %1110  ;;  %1112 = vrcp.f32 %v532_v29  ;;  %v544_v50 = vand.u32 2147483648, %v532_v29  ;;  %v542_v51 = vand.u32 2147483647, %v532_v29  ;;  %vm538_vm6 = vweird.f32 %v532_v29 }
 0x148   :  { %v515_v31 = vmul.f32 %v1111_v30, %v513_v24  ;;  %vm520_vm1 = vweird.f32 %v1111_v30 }
 0x149   :  { %v610_v32 = vpop.f32.mrf.mxu1  ;;  %vm521_vm3 = vmor %vm519_vm2, %vm520_vm1  ;;  %v545_v55 = vor.u32 1.1754944e-38, %v544_v50  ;;  %vm543_vm8 = vcmp.eq.f32.partialorder %v542_v51, 8.507059e+37 }
 0x14a   :  { %v516_v33 = vsub.f32 1.0, %v515_v31 }
 0x14c   :  { %v517_v36 = vmul.f32 %v1111_v30, %v516_v33 }
 0x14d   :  { %v1113_v38 = vpop.eup %1112 }
 0x14e   :  { %v534_v40 = vmul.f32 %v1113_v38, %v532_v29  ;;  %v518_v41 = vadd.f32 %v1111_v30, %v517_v36  ;;  %vm539_vm5 = vweird.f32 %v1113_v38 }
 0x14f   :  { %vm540_vm7 = vmor %vm538_vm6, %vm539_vm5 }
 0x150   :  { %v535_v44 = vsub.f32 1.0, %v534_v40  ;;  %v522_v45 = vsel %vm521_vm3, %v1111_v30, %v518_v41 }
 0x151   :  { %v527_v47 = vsel %vm524_vm4, %v526_v43, %v522_v45 }
 0x152   :  { %v676_v48 = vmul.f32 %v673_v42, %v527_v47  ;;  %v536_v49 = vmul.f32 %v1113_v38, %v535_v44 }
 0x154   :  { %v677_v52 = vadd.f32 %v676_v48, %v609_v46  ;;  %v537_v53 = vadd.f32 %v1113_v38, %v536_v49 }
 0x156   :  { %1114 = vtanh.f32 %v677_v52  ;;  %v541_v54 = vsel %vm540_vm7, %v1113_v38, %v537_v53 }
 0x157   :  { %v546_v56 = vsel %vm543_vm8, %v545_v55, %v541_v54 }
 0x158   :  { %v679_v57 = vsub.f32 1.0, %v546_v56  ;;  %v681_v60 = vmul.f32 %v546_v56, %v1449_v25 }
 0x15c   :  { %v1115_v58 = vpop.eup %1114 }
 0x15d   :  { %v680_v59 = vmul.f32 %v1115_v58, %v679_v57 }
 0x15f   :  { %v682_v61 = vadd.f32 %v681_v60, %v680_v59 }
 0x161   :  { %v683_v62 = vpack.c.bf16 %v682_v61, %v682_v61  ;;  %749 = vst [vmem:[#allocation15] sm:$0xff] %v682_v61 }
 0x162   :  { %771 = dma.vmem_to_hbm [thread:$0]  %s767_s9, 128, %s769_s29, [#allocation16]  }
 0x163   :  { %743 = vmatmul.bf16.vlgmr.msrb.gmra.mxu3 %v683_v62 }
 0x1e6   :  { %v744_v25 = vpop.f32.mrf.mxu3 }
 0x1e7   :  { %v745_v0 = vadd.f32 %v1105_v63, %v744_v25 }
 0x1e9   :  { %748 = vst [vmem:[#allocation14] sm:$0xff] %v745_v0 }
 0x1ea   :  { %760 = dma.vmem_to_hbm [thread:$0]  %s756_s8, 128, %s758_s18, [#allocation4]  }
 0x1ee   :  { %v746_v1 = vpop.f32.mrf.mxu3 }
 0x1ef   :  { %1340 = dma.done.wait [#allocation4], 128  }
 0x1f0   :  { %1341 = vsyncadd [#allocation4], 4294967168 }
 0x1f1   :  { %1342 = dma.done.wait [#allocation16], 128  }
 0x1f2   :  { %1343 = vsyncadd [#allocation16], 4294967168 }
 0x1f3   :  { %780 = vsyncpa [#allocation3], 1 }
 0x1f4   :  { %781 = vsyncpa [#allocation6], 1 }
 0x1f5   :  { %782 = vsyncpa [#allocation9], 1 }
 0x1f6   :  { %783 = vsyncpa [#allocation12], 1 }
 0x1f7   :  { %784 = vsyncpa [#allocation4], 1 }
 0x1f8   :  { %785 = vsyncpa [#allocation16], 1 }

</bundles_post_ra>
